<compile_context>
chip_gen: v6e
topology: v6e:2x2x1
jax: 0.10.0
libtpu: 0.0.40
codegen_flags: <defaults>
</compile_context>

<pallas_src>
import math
import functools

import jax
import jax.numpy as jnp
from jax import lax
from jax.experimental import pallas as pl
from jax.experimental.pallas import tpu as pltpu


def _round_up(x, m):
    return (x + m - 1) // m * m


def _pad_to(x, shape):
    pads = [(0, s - d) for d, s in zip(x.shape, shape)]
    if any(p[1] for p in pads):
        return jnp.pad(x, pads)
    return x


def _default_tq_block(tq):
    if tq < 128:
        return _round_up(tq, 16)        # bf16 packs 16 rows / sublane group
    wide_mxu = False
    try:
        kind = jax.devices()[0].device_kind.lower()
        wide_mxu = "v5" not in kind      # v6e / v7x: 2x256x256 MXU
    except Exception:
        pass
    if wide_mxu and tq >= 256:
        return 256
    return 128


def _vmem_limit_bytes(tq_blk, tk_blk, n_k, e, tk_p):
    bf2, f4 = 2, 4
    need = (2 * tq_blk * e * bf2                 # q blocks (double-buffered)
            + 2 * 2 * tk_blk * e * bf2           # k, v blocks (double-buffered)
            + 2 * tq_blk * e * bf2               # ctx output blocks
            + 2 * tq_blk * tk_p * bf2            # attn output blocks
            + (n_k * tq_blk * tk_blk + tq_blk * e + 2 * tq_blk) * f4  # scratch
            + 6 * tq_blk * tk_blk * f4)          # in-flight temporaries
    need = int(need * 1.5) + (4 << 20)
    try:
        cap = pltpu.get_tpu_info().vmem_capacity_bytes
    except Exception:
        cap = 64 << 20                           # conservative (v7x per-TC)
    return max(32 << 20, min(need, int(cap * 0.9)))


def _attn_core_kernel(q_ref, k_ref, v_ref, ctx_ref, attn_ref,
                      m_ref, l_ref, acc_ref, s_ref, *, tk, tk_blk, n_k):
    """Flash-style attention core for one (batch, q-tile, kv-tile) grid step.

    q_ref    : (1, TQ_BLK, E)       bf16  projected queries (resident over kv)
    k_ref    : (1, TK_BLK, E)       bf16  projected keys, current kv block
    v_ref    : (1, TK_BLK, E)       bf16  projected values, current kv block
    ctx_ref  : (1, TQ_BLK, E)       bf16  out: unscaled context (last kv step)
    attn_ref : (1, TQ_BLK, Tk_p)    bf16  out: softmax weights (last kv step)
    m/l_ref  : (TQ_BLK, 1)          f32   running max / normalizer (scratch)
    acc_ref  : (TQ_BLK, E)          f32   running unnormalized context (scratch)
    s_ref    : (n_k, TQ_BLK, TK_BLK) f32  raw scores per kv block (scratch)
    """
    kv = pl.program_id(2)

    @pl.when(kv == 0)
    def _init():
        m_ref[...] = jnp.full(m_ref.shape, -jnp.inf, dtype=m_ref.dtype)
        l_ref[...] = jnp.zeros(l_ref.shape, dtype=l_ref.dtype)
        acc_ref[...] = jnp.zeros(acc_ref.shape, dtype=acc_ref.dtype)

    q = q_ref[0]
    k = k_ref[0]
    v = v_ref[0]

    # scores = q @ k^T -> (TQ_BLK, TK_BLK), f32 accumulation on the MXU.
    s = lax.dot_general(q, k, (((1,), (1,)), ((), ())),
                        preferred_element_type=jnp.float32)

    # Mask zero-padded encoder positions (only the last kv block has any).
    if tk % tk_blk != 0:
        col = lax.broadcasted_iota(jnp.int32, s.shape, 1) + kv * tk_blk
        s = jnp.where(col < tk, s, -jnp.inf)

    if n_k > 1:
        # Keep raw f32 scores so the externally returned attn map is the exact
        # softmax (no bf16 rescale-and-rewrite of previously stored blocks).
        s_ref[kv] = s

    # Online (flash) softmax update.
    m_prev = m_ref[...]
    m_new = jnp.maximum(m_prev, jnp.max(s, axis=-1, keepdims=True))
    alpha = jnp.exp(m_prev - m_new)
    p = jnp.exp(s - m_new)
    l_new = alpha * l_ref[...] + jnp.sum(p, axis=-1, keepdims=True)
    acc_new = alpha * acc_ref[...] + lax.dot_general(
        p.astype(v.dtype), v, (((1,), (0,)), ((), ())),
        preferred_element_type=jnp.float32)
    m_ref[...] = m_new
    l_ref[...] = l_new
    acc_ref[...] = acc_new

    # TODO(synk): mask / last_attended windowing not implemented (None path only).
    # TODO(synk): dropout (p=0.1) omitted -- eval-mode (identity) semantics.

    @pl.when(kv == n_k - 1)
    def _finalize():
        inv_l = pl.reciprocal(l_new, approx=True)       # EUP slot
        ctx_ref[0] = (acc_new * inv_l).astype(ctx_ref.dtype)
        if n_k == 1:
            attn_ref[0] = (p * inv_l).astype(attn_ref.dtype)
        else:
            # Static unroll: lane-dense, 128-aligned stores into the resident
            # attn output tile (written back to HBM once per q-tile).
            for j in range(n_k):
                blk = (jnp.exp(s_ref[j] - m_new) * inv_l).astype(attn_ref.dtype)
                attn_ref[0, :, pl.ds(j * tk_blk, tk_blk)] = blk


def attention_layer(query, keys, values, params, *, tq_block=None, tk_block=None):
    """Pallas implementation of DeepVoice3 AttentionLayer.forward
    (mask=None, last_attended=None, eval mode). Returns (x_f32, attn_bf16)."""
    B, Tq, C = query.shape
    E, Tk = keys.shape[1], keys.shape[2]
    assert values.shape == (B, Tk, E)

    wq, bq = params["wq"], params["bq"]   # (E, C), (E,)
    wk, bk = params["wk"], params["bk"]   # (E, E), (E,)
    wv, bv = params["wv"], params["bv"]   # (E, E), (E,)
    wo, bo = params["wo"], params["bo"]   # (C, E), (C,)

    f32 = jnp.float32
    bf16 = jnp.bfloat16

    # ---- Tile-size selection.
    if tq_block is None:
        tq_block = _default_tq_block(Tq)
    tq_block = _round_up(min(tq_block, max(Tq, 16)), 16)
    Tq_p = _round_up(Tq, tq_block)
    n_q = Tq_p // tq_block

    if tk_block is None:
        tk_block = 512 if Tk > 512 else _round_up(Tk, 128)
    else:
        tk_block = _round_up(tk_block, 128)
    Tk_p = _round_up(Tk, tk_block)
    n_k = Tk_p // tk_block

    # ---- Hoisted projections: pad the (small) raw inputs first so the bias-add
    # and bf16 cast fuse into the GEMM epilogue and the activations are written
    # once, already padded and in bf16. E (head dim) is intentionally NOT padded.
    q_pad = _pad_to(query, (B, Tq_p, C))
    k_pad = _pad_to(keys, (B, E, Tk_p))
    v_pad = _pad_to(values, (B, Tk_p, E))

    qp = (jnp.einsum("btc,ec->bte", q_pad, wq, preferred_element_type=f32)
          + bq).astype(bf16)
    kp = (jnp.einsum("bet,fe->btf", k_pad, wk, preferred_element_type=f32)
          + bk).astype(bf16)
    vp = (jnp.einsum("bte,fe->btf", v_pad, wv, preferred_element_type=f32)
          + bv).astype(bf16)

    kernel = functools.partial(_attn_core_kernel, tk=Tk, tk_blk=tk_block, n_k=n_k)

    cost = pl.CostEstimate(
        flops=4 * B * Tq_p * Tk_p * E,
        transcendentals=2 * B * Tq_p * Tk_p,
        bytes_accessed=2 * B * (Tq_p * E + 2 * n_q * Tk_p * E
                                + Tq_p * E + Tq_p * Tk_p))

    # Megacore: shard on batch; keep the q-tile axis serial when B >= 2 so the
    # two cores never stream the same K/V blocks.
    qi_sem = "arbitrary" if B >= 2 else "parallel"

    ctx_p, attn_p = pl.pallas_call(
        kernel,
        out_shape=(jax.ShapeDtypeStruct((B, Tq_p, E), bf16),
                   jax.ShapeDtypeStruct((B, Tq_p, Tk_p), bf16)),
        grid_spec=pltpu.PrefetchScalarGridSpec(
            num_scalar_prefetch=0,
            grid=(B, n_q, n_k),
            in_specs=[
                pl.BlockSpec((1, tq_block, E), lambda b, qi, kv: (b, qi, 0)),  # qp
                pl.BlockSpec((1, tk_block, E), lambda b, qi, kv: (b, kv, 0)),  # kp
                pl.BlockSpec((1, tk_block, E), lambda b, qi, kv: (b, kv, 0)),  # vp
            ],
            out_specs=[
                pl.BlockSpec((1, tq_block, E), lambda b, qi, kv: (b, qi, 0)),    # ctx
                pl.BlockSpec((1, tq_block, Tk_p), lambda b, qi, kv: (b, qi, 0)), # attn
            ],
            scratch_shapes=[
                pltpu.VMEM((tq_block, 1), f32),              # running max
                pltpu.VMEM((tq_block, 1), f32),              # running normalizer
                pltpu.VMEM((tq_block, E), f32),              # running context
                pltpu.VMEM((n_k, tq_block, tk_block), f32),  # raw scores
            ],
        ),
        compiler_params=pltpu.CompilerParams(
            dimension_semantics=("parallel", qi_sem, "arbitrary"),
            vmem_limit_bytes=_vmem_limit_bytes(tq_block, tk_block, n_k, E, Tk_p)),
        cost_estimate=cost,
    )(qp, kp, vp)

    ctx = ctx_p[:, :Tq, :]               # bf16 unscaled context
    attn = attn_p[:, :Tq, :Tk]           # bf16 attention map (cast if f32 needed)

    # ---- Out projection with constants folded into the weights:
    #   (ctx * kv_scale) @ wo^T + bo, then (out + q) * sqrt(0.5)
    #   == ctx @ (wo * kv_scale * sqrt(0.5))^T + bo*sqrt(0.5) + q*sqrt(0.5)
    kv_scale = float(Tk) * math.sqrt(1.0 / float(Tk))   # == sqrt(Tk)
    res_scale = math.sqrt(0.5)
    wo_eff = wo * (kv_scale * res_scale)
    bo_eff = bo * res_scale
    out = (jnp.einsum("bte,ce->btc", ctx, wo_eff, preferred_element_type=f32)
           + bo_eff + query * res_scale)
    return out, attn


def _reference(query, keys, values, params):
    """Plain-JAX f32 reference mirroring the PyTorch forward (eval mode)."""
    wq, bq = params["wq"], params["bq"]
    wk, bk = params["wk"], params["bk"]
    wv, bv = params["wv"], params["bv"]
    wo, bo = params["wo"], params["bo"]
    residual = query
    v = jnp.einsum("bte,fe->btf", values, wv) + bv
    k = jnp.einsum("bet,fe->bft", keys, wk) + bk[None, :, None]
    x = jnp.einsum("btc,ec->bte", query, wq) + bq
    x = jnp.einsum("bqe,bet->bqt", x, k)
    x = jax.nn.softmax(x, axis=-1)
    attn = x
    s = values.shape[1]
    x = jnp.einsum("bqt,bte->bqe", x, v) * (s * math.sqrt(1.0 / s))
    x = jnp.einsum("bqe,ce->bqc", x, wo) + bo
    x = (x + residual) * math.sqrt(0.5)
    return x, attn


def make_params(key, conv_channels, embed_dim):
    ks = jax.random.split(key, 8)
    scale = 0.1
    wq = scale * jax.random.normal(ks[0], (embed_dim, conv_channels), jnp.float32)
    bq = scale * jax.random.normal(ks[1], (embed_dim,), jnp.float32)
    # __init__: key_projection.weight cloned from query_projection when
    # conv_channels == embed_dim (bias not cloned).
    if conv_channels == embed_dim:
        wk = wq
    else:
        wk = scale * jax.random.normal(ks[2], (embed_dim, embed_dim), jnp.float32)
    bk = scale * jax.random.normal(ks[3], (embed_dim,), jnp.float32)
    wv = scale * jax.random.normal(ks[4], (embed_dim, embed_dim), jnp.float32)
    bv = scale * jax.random.normal(ks[5], (embed_dim,), jnp.float32)
    wo = scale * jax.random.normal(ks[6], (conv_channels, embed_dim), jnp.float32)
    bo = scale * jax.random.normal(ks[7], (conv_channels,), jnp.float32)
    return dict(wq=wq, bq=bq, wk=wk, bk=bk, wv=wv, bv=bv, wo=wo, bo=bo)


def _run_case(seed_key, B, Tq, Tk, C, E, tq_block=None, tk_block=None):
    k_q, k_k, k_v, k_p = jax.random.split(seed_key, 4)
    query = jax.random.normal(k_q, (B, Tq, C), jnp.float32)
    keys = jax.random.normal(k_k, (B, E, Tk), jnp.float32)
    values = jax.random.normal(k_v, (B, Tk, E), jnp.float32)
    params = make_params(k_p, C, E)

    out, attn = attention_layer(query, keys, values, params,
                                tq_block=tq_block, tk_block=tk_block)
    jax.block_until_ready((out, attn))

    ref_out, ref_attn = _reference(query, keys, values, params)
    assert out.shape == ref_out.shape and attn.shape == ref_attn.shape
    # bf16 MXU inputs / bf16 kernel outputs -> bf16-appropriate tolerances.
    assert jnp.allclose(out, ref_out, atol=3e-2, rtol=3e-2)
    assert jnp.allclose(attn.astype(jnp.float32), ref_attn, atol=3e-2, rtol=3e-2)


if __name__ == "__main__":
    key = jax.random.PRNGKey(0)
    k1, k2 = jax.random.split(key)

    # Case 1: tiny decoder step (single K/V block, n_k == 1 fast path,
    # conv_channels == embed_dim so the key weights are cloned from query).
    _run_case(k1, B=2, Tq=8, Tk=16, C=32, E=32)

    # Case 2: exercises the flash-style Tk-blocked path (n_k = 2), multiple
    # query tiles (n_q = 2), and the padded-key mask in the last block.
    _run_case(k2, B=2, Tq=136, Tk=200, C=16, E=32, tk_block=128)

    print("KERNEL_OK")
</pallas_src>

<mosaic_0001>
module attributes {stable_mosaic.version = 11 : i64} {
  func.func @_attn_core_kernel(%arg0: i32, %arg1: i32, %arg2: i32, %arg3: memref<1x16x32xbf16, #tpu.memory_space<vmem>>, %arg4: memref<1x128x32xbf16, #tpu.memory_space<vmem>>, %arg5: memref<1x128x32xbf16, #tpu.memory_space<vmem>>, %arg6: memref<1x16x32xbf16, #tpu.memory_space<vmem>>, %arg7: memref<1x16x128xbf16, #tpu.memory_space<vmem>>, %arg8: memref<16x1xf32, #tpu.memory_space<vmem>>, %arg9: memref<16x1xf32, #tpu.memory_space<vmem>>, %arg10: memref<16x32xf32, #tpu.memory_space<vmem>>, %arg11: memref<1x16x128xf32, #tpu.memory_space<vmem>>) attributes {dimension_semantics = [#tpu.dimension_semantics<parallel>, #tpu.dimension_semantics<arbitrary>, #tpu.dimension_semantics<arbitrary>], iteration_bounds = array<i64: 2, 1, 1>, scalar_prefetch = 0 : i64, scratch_operands = 4 : i64, tpu.core_type = #tpu.core_type<tc>, window_params = [{transform_indices = @transform_0, window_bounds = array<i64: 1, 16, 32>}, {transform_indices = @transform_1, window_bounds = array<i64: 1, 128, 32>}, {transform_indices = @transform_2, window_bounds = array<i64: 1, 128, 32>}, {transform_indices = @transform_3, window_bounds = array<i64: 1, 16, 32>}, {transform_indices = @transform_4, window_bounds = array<i64: 1, 16, 128>}]} {
    %c0_i32 = arith.constant 0 : i32
    %0 = arith.cmpi eq, %arg2, %c0_i32 : i32
    %1 = arith.extui %0 : i1 to i32
    %c0_i32_0 = arith.constant 0 : i32
    %2 = arith.cmpi ne, %1, %c0_i32_0 : i32
    scf.if %2 {
      %cst_27 = arith.constant 0xFF800000 : f32
      %44 = vector.broadcast %cst_27 : f32 to vector<16x1xf32>
      %c0_28 = arith.constant 0 : index
      %c0_29 = arith.constant 0 : index
      %45 = vector.load %arg8[%c0_28, %c0_29] : memref<16x1xf32, #tpu.memory_space<vmem>>, vector<16x1xf32>
      tpu.vector_store %arg8[%c0_28, %c0_29], %44 {strides = array<i32>} : memref<16x1xf32, #tpu.memory_space<vmem>>, vector<16x1xf32>,
      %cst_30 = arith.constant 0.000000e+00 : f32
      %46 = vector.broadcast %cst_30 : f32 to vector<16x1xf32>
      %c0_31 = arith.constant 0 : index
      %c0_32 = arith.constant 0 : index
      %47 = vector.load %arg9[%c0_31, %c0_32] : memref<16x1xf32, #tpu.memory_space<vmem>>, vector<16x1xf32>
      tpu.vector_store %arg9[%c0_31, %c0_32], %46 {strides = array<i32>} : memref<16x1xf32, #tpu.memory_space<vmem>>, vector<16x1xf32>,
      %cst_33 = arith.constant 0.000000e+00 : f32
      %48 = vector.broadcast %cst_33 : f32 to vector<16x32xf32>
      %c0_34 = arith.constant 0 : index
      %c0_35 = arith.constant 0 : index
      %49 = vector.load %arg10[%c0_34, %c0_35] : memref<16x32xf32, #tpu.memory_space<vmem>>, vector<16x32xf32>
      tpu.vector_store %arg10[%c0_34, %c0_35], %48 {strides = array<i32>} : memref<16x32xf32, #tpu.memory_space<vmem>>, vector<16x32xf32>,
    } else {
    }
    %c0 = arith.constant 0 : index
    %c0_1 = arith.constant 0 : index
    %c0_2 = arith.constant 0 : index
    %3 = vector.load %arg3[%c0, %c0_1, %c0_2] : memref<1x16x32xbf16, #tpu.memory_space<vmem>>, vector<1x16x32xbf16>
    %4 = vector.shape_cast %3 : vector<1x16x32xbf16> to vector<16x32xbf16>
    %c0_3 = arith.constant 0 : index
    %c0_4 = arith.constant 0 : index
    %c0_5 = arith.constant 0 : index
    %5 = vector.load %arg4[%c0_3, %c0_4, %c0_5] : memref<1x128x32xbf16, #tpu.memory_space<vmem>>, vector<1x128x32xbf16>
    %6 = vector.shape_cast %5 : vector<1x128x32xbf16> to vector<128x32xbf16>
    %c0_6 = arith.constant 0 : index
    %c0_7 = arith.constant 0 : index
    %c0_8 = arith.constant 0 : index
    %7 = vector.load %arg5[%c0_6, %c0_7, %c0_8] : memref<1x128x32xbf16, #tpu.memory_space<vmem>>, vector<1x128x32xbf16>
    %8 = vector.shape_cast %7 : vector<1x128x32xbf16> to vector<128x32xbf16>
    %cst = arith.constant dense<0.000000e+00> : vector<16x128xf32>
    %9 = tpu.matmul %4, %6, %cst {dimension_numbers = #tpu.dot_dimension_numbers<[1], [1], [0], [0], [0, 0, 1, 0], [], []>} : vector<16x32xbf16>, vector<128x32xbf16>, vector<16x128xf32> -> vector<16x128xf32>
    %10 = tpu.iota {dimensions = array<i32: 1>} : vector<16x128xi32>
    %c128_i32 = arith.constant 128 : i32
    %11 = arith.muli %arg2, %c128_i32 : i32
    %12 = vector.broadcast %11 : i32 to vector<16x128xi32>
    %13 = arith.addi %10, %12 : vector<16x128xi32>
    %c16_i32 = arith.constant 16 : i32
    %14 = vector.broadcast %c16_i32 : i32 to vector<16x128xi32>
    %15 = arith.cmpi slt, %13, %14 : vector<16x128xi32>
    %cst_9 = arith.constant 0xFF800000 : f32
    %16 = vector.broadcast %cst_9 : f32 to vector<16x128xf32>
    %17 = arith.select %15, %9, %16 : vector<16x128xi1>, vector<16x128xf32>
    %c0_10 = arith.constant 0 : index
    %c0_11 = arith.constant 0 : index
    %18 = vector.load %arg8[%c0_10, %c0_11] : memref<16x1xf32, #tpu.memory_space<vmem>>, vector<16x1xf32>
    %cst_12 = arith.constant dense<0xFF800000> : vector<16xf32>
    %19 = vector.multi_reduction <maximumf>, %17, %cst_12 [1] : vector<16x128xf32> to vector<16xf32>
    %20 = vector.shape_cast %19 : vector<16xf32> to vector<16x1xf32>
    %21 = arith.maximumf %18, %20 : vector<16x1xf32>
    %22 = arith.subf %18, %21 : vector<16x1xf32>
    %23 = math.exp %22 : vector<16x1xf32>
    %24 = vector.broadcast %21 : vector<16x1xf32> to vector<16x128xf32>
    %25 = arith.subf %17, %24 : vector<16x128xf32>
    %26 = math.exp %25 : vector<16x128xf32>
    %c0_13 = arith.constant 0 : index
    %c0_14 = arith.constant 0 : index
    %27 = vector.load %arg9[%c0_13, %c0_14] : memref<16x1xf32, #tpu.memory_space<vmem>>, vector<16x1xf32>
    %28 = arith.mulf %23, %27 : vector<16x1xf32>
    %cst_15 = arith.constant dense<0.000000e+00> : vector<16xf32>
    %29 = vector.multi_reduction <add>, %26, %cst_15 [1] : vector<16x128xf32> to vector<16xf32>
    %30 = vector.shape_cast %29 : vector<16xf32> to vector<16x1xf32>
    %31 = arith.addf %28, %30 : vector<16x1xf32>
    %c0_16 = arith.constant 0 : index
    %c0_17 = arith.constant 0 : index
    %32 = vector.load %arg10[%c0_16, %c0_17] : memref<16x32xf32, #tpu.memory_space<vmem>>, vector<16x32xf32>
    %33 = vector.broadcast %23 : vector<16x1xf32> to vector<16x32xf32>
    %34 = arith.mulf %33, %32 : vector<16x32xf32>
    %35 = arith.truncf %26 : vector<16x128xf32> to vector<16x128xbf16>
    %cst_18 = arith.constant dense<0.000000e+00> : vector<16x32xf32>
    %36 = tpu.matmul %35, %8, %cst_18 {dimension_numbers = #tpu.dot_dimension_numbers<[1], [0], [0], [1], [0, 0, 1, 1], [], []>} : vector<16x128xbf16>, vector<128x32xbf16>, vector<16x32xf32> -> vector<16x32xf32>
    %37 = arith.addf %34, %36 : vector<16x32xf32>
    %c0_19 = arith.constant 0 : index
    %c0_20 = arith.constant 0 : index
    %38 = vector.load %arg8[%c0_19, %c0_20] : memref<16x1xf32, #tpu.memory_space<vmem>>, vector<16x1xf32>
    tpu.vector_store %arg8[%c0_19, %c0_20], %21 {strides = array<i32>} : memref<16x1xf32, #tpu.memory_space<vmem>>, vector<16x1xf32>,
    %c0_21 = arith.constant 0 : index
    %c0_22 = arith.constant 0 : index
    %39 = vector.load %arg9[%c0_21, %c0_22] : memref<16x1xf32, #tpu.memory_space<vmem>>, vector<16x1xf32>
    tpu.vector_store %arg9[%c0_21, %c0_22], %31 {strides = array<i32>} : memref<16x1xf32, #tpu.memory_space<vmem>>, vector<16x1xf32>,
    %c0_23 = arith.constant 0 : index
    %c0_24 = arith.constant 0 : index
    %40 = vector.load %arg10[%c0_23, %c0_24] : memref<16x32xf32, #tpu.memory_space<vmem>>, vector<16x32xf32>
    tpu.vector_store %arg10[%c0_23, %c0_24], %37 {strides = array<i32>} : memref<16x32xf32, #tpu.memory_space<vmem>>, vector<16x32xf32>,
    %c0_i32_25 = arith.constant 0 : i32
    %41 = arith.cmpi eq, %arg2, %c0_i32_25 : i32
    %42 = arith.extui %41 : i1 to i32
    %c0_i32_26 = arith.constant 0 : i32
    %43 = arith.cmpi ne, %42, %c0_i32_26 : i32
    scf.if %43 {
      %44 = tpu.reciprocal %31 {approx = true} : vector<16x1xf32> -> vector<16x1xf32>
      %45 = vector.broadcast %44 : vector<16x1xf32> to vector<16x32xf32>
      %46 = arith.mulf %37, %45 : vector<16x32xf32>
      %47 = arith.truncf %46 : vector<16x32xf32> to vector<16x32xbf16>
      %c0_27 = arith.constant 0 : index
      %c0_28 = arith.constant 0 : index
      %c0_29 = arith.constant 0 : index
      %48 = vector.load %arg6[%c0_27, %c0_28, %c0_29] : memref<1x16x32xbf16, #tpu.memory_space<vmem>>, vector<1x16x32xbf16>
      %49 = vector.shape_cast %48 : vector<1x16x32xbf16> to vector<16x32xbf16>
      %50 = vector.shape_cast %47 : vector<16x32xbf16> to vector<1x16x32xbf16>
      tpu.vector_store %arg6[%c0_27, %c0_28, %c0_29], %50 {strides = array<i32>} : memref<1x16x32xbf16, #tpu.memory_space<vmem>>, vector<1x16x32xbf16>,
      %51 = vector.broadcast %44 : vector<16x1xf32> to vector<16x128xf32>
      %52 = arith.mulf %26, %51 : vector<16x128xf32>
      %53 = arith.truncf %52 : vector<16x128xf32> to vector<16x128xbf16>
      %c0_30 = arith.constant 0 : index
      %c0_31 = arith.constant 0 : index
      %c0_32 = arith.constant 0 : index
      %54 = vector.load %arg7[%c0_30, %c0_31, %c0_32] : memref<1x16x128xbf16, #tpu.memory_space<vmem>>, vector<1x16x128xbf16>
      %55 = vector.shape_cast %54 : vector<1x16x128xbf16> to vector<16x128xbf16>
      %56 = vector.shape_cast %53 : vector<16x128xbf16> to vector<1x16x128xbf16>
      tpu.vector_store %arg7[%c0_30, %c0_31, %c0_32], %56 {strides = array<i32>} : memref<1x16x128xbf16, #tpu.memory_space<vmem>>, vector<1x16x128xbf16>,
    } else {
    }
    return
  }
  func.func @transform_0(%arg0: i32, %arg1: i32, %arg2: i32) -> (i32, i32, i32) {
    %c0_i32 = arith.constant 0 : i32
    %c0_i32_0 = arith.constant 0 : i32
    return %arg0, %arg1, %c0_i32 : i32, i32, i32
  }
  func.func @transform_1(%arg0: i32, %arg1: i32, %arg2: i32) -> (i32, i32, i32) {
    %c0_i32 = arith.constant 0 : i32
    %c0_i32_0 = arith.constant 0 : i32
    return %arg0, %arg2, %c0_i32 : i32, i32, i32
  }
  func.func @transform_2(%arg0: i32, %arg1: i32, %arg2: i32) -> (i32, i32, i32) {
    %c0_i32 = arith.constant 0 : i32
    %c0_i32_0 = arith.constant 0 : i32
    return %arg0, %arg2, %c0_i32 : i32, i32, i32
  }
  func.func @transform_3(%arg0: i32, %arg1: i32, %arg2: i32) -> (i32, i32, i32) {
    %c0_i32 = arith.constant 0 : i32
    %c0_i32_0 = arith.constant 0 : i32
    return %arg0, %arg1, %c0_i32 : i32, i32, i32
  }
  func.func @transform_4(%arg0: i32, %arg1: i32, %arg2: i32) -> (i32, i32, i32) {
    %c0_i32 = arith.constant 0 : i32
    %c0_i32_0 = arith.constant 0 : i32
    return %arg0, %arg1, %c0_i32 : i32, i32, i32
  }
}

</mosaic_0001>

<bundles_post_ra>
// kernel: tpu_custom_call.1
= control target key start
LH: loop header
LB: loop body
LE: loop exit
PB: predicated region body
PF: predicated region fallthrough
CT: control target
= control target key end

     0   :  { %10 = vsyncpa [#allocation7], 0  ;;  %s1457_s0 = inlined_call_operand.vmem [shape: bf16[2,16,32], index: 0, kind: input, shape index: {}]   ;;  %s1458_s1 = inlined_call_operand.vmem [shape: bf16[2,128,32], index: 1, kind: input, shape index: {}]   ;;  %s1459_s2 = inlined_call_operand.vmem [shape: bf16[2,128,32], index: 2, kind: input, shape index: {}]   ;;  %s1460_s3 = inlined_call_operand.hbm [shape: bf16[2,16,32], index: 3, kind: output, shape index: {0}]   ;;  %s1461_s4 = inlined_call_operand.hbm [shape: bf16[2,16,128], index: 4, kind: output, shape index: {1}]  }
   0x1   :  { %12 = vsyncpa [#allocation7 + $0x1], 0 }
   0x2   :  { %13 = vsyncpa [#allocation9], 0 }
   0x3   :  { %15 = vsyncpa [#allocation9 + $0x1], 0  ;;  %s1227_s15 = smov 0   ;;  %s1229_s16 = smov 0  }
   0x4   :  { %s1231_s17 = smov 0   ;;  %s1233_s18 = smov 0  }
   0x5   :  { %s1235_s19 = smov 0   ;;  %s1237_s20 = smov 0  }
   0x6 LB: > { %s874_s21 = sadd.s32 4294967295, %s1192_s20   ;;  %s875_s22 = sadd.s32 4294967294, %s1192_s20   ;;  %s1192_s20 = sphi %s1237_s20, %s21_s20   ;;  %s1188_s19 = sphi %s1235_s19, %s1468_s19   ;;  %s1184_s18 = sphi %s1233_s18, %s1467_s18   ;;  %s1180_s17 = sphi %s1231_s17, %s1466_s17   ;;  %s1176_s16 = sphi %s1229_s16, %s1465_s16   ;;  %s1172_s15 = sphi %s1227_s15, %s1464_s15  }
   0x7   : > { %s40_s23 = sadd.s32 1, %s1188_s19  ;;  %s133_s24 = sadd.s32 1, %s1180_s17 }
   0x8   : > { %p42_p0 = scmp.ge.s32.totalorder %s40_s23, 2  ;;  %p143_p1 = scmp.ne.s32.totalorder %s1180_s17, %s1176_s16 }
   0x9   : > { %p144_p2 = scmp.eq.s32.totalorder %s874_s21, 1  ;;  %p149_p3 = scmp.ne.s32.totalorder %s1176_s16, %s1172_s15 }
   0xa   : > { %s1470_s23 = smov (%p42_p0, %s40_s23), 0  ;;  %p150_p5 = scmp.eq.s32.totalorder %s875_s22, 1 }
   0xb   : > { %p1267_p4 = por %p144_p2, %p143_p1  ;;  %s128_s26 = ssub.s32 %s1188_s19, %s1470_s23 }
   0xc   : > { %p878_p6 = scmp.ge.s32.totalorder %s1192_s20, 1  ;;  %p131_p7 = scmp.eq.s32.totalorder %s128_s26, 0 }
   0xd   : > { %p1274_p8 = por %p150_p5, %p149_p3  ;;  %p235_p9 = scmp.lt.s32.totalorder %s1192_s20, 3 }
   0xe   : > { %s1280_s28 = scalar_select %p131_p7, %s1180_s17, %s133_s24  }
   0xf   : > { %p236_p10 = pnand %p878_p6, %p235_p9 }
  0x10   : > { %p289_p11 = scmp.lt.s32.totalorder (!%p236_p10), %s1184_s18, 1  ;;  %s1365_s21 = sand.u32 (!%p236_p10), 1, %s1176_s16  }
  0x11   : > { %239 = sbr.rel (%p236_p10) target bundleno = 889 (0x379), region = 32  ;;  %s879_s22 = sshll.u32 (!%p236_p10), %s1365_s21, 3 }
  0x12   : > { %s280_s24 = scalar_lea.vmem (!%p236_p10), [#allocation6], %s879_s22  ;;  %s924_s5 = sshll.u32 (!%p236_p10), %s1184_s18, 7 }
  0x13   : > { %s703_s26 = sshll.u32 (!%p236_p10), %s280_s24, 4  ;;  %s1382_s10 = scalar_lea.hbm (!%p236_p10), %s1461_s4, %s924_s5  ;;  %s1370_s26 = int_to_ptr.vmem [resolvable:$true] %s703_s26 }
  0x14   : > { %s1086_s12 = scalar_lea.vmem (!%p236_p10), %s1370_s26, 128  ;;  %s1198_s13 = smov (!%p236_p10), [#allocation6]  }
  0x15   : > { %p1087_p12 = scmp.ne.s32.totalorder (!%p236_p10), %s1370_s26, %s1086_s12 }
  0x16   : > { %vm330_vm0 = vcmask 261120   ;;  %v1194_v0 = vmov 0.0   ;;  %vm1195_vm1 = vmmov 0   ;;  %s1290_s29 = scalar_select %p289_p11, %s1184_s18, 1  ;;  %vm325_vm2 = vcmask 7168  }
  0x17   : > { %949 = vmatprep.subr.bf16.mxu0 %v1194_v0  ;;  %331 = vst.msk [vmem:[#allocation4] sm:$0xff] %vm330_vm0, %v1194_v0  ;;  %332 = vst.msk [vmem:[#allocation4 + $0x8] sm:$0xff] %vm330_vm0, %v1194_v0  ;;  %965 = vmatprep.mubr.msk.bf16.mxu0 %vm1195_vm1, %v1194_v0  ;;  %v1196_v18 = vmov -inf   ;;  %v481_v19 = vlaneseq  ;;  %v1197_v27 = vmov 0   ;;  %vm667_vm4 = vcmask 257024   ;;  %p1088_p13 = pnand %p1087_p12, %p1267_p4 }
  0x18   : > { %969 = vmatprep.subr.bf16.mxu1 %v1194_v0  ;;  %985 = vmatprep.mubr.msk.bf16.mxu1 %vm1195_vm1, %v1194_v0  ;;  %s918_s30 = sshll.u32 %s1290_s29, 6  ;;  %s917_s8 = sshll.u32 %s1290_s29, 3  ;;  %326 = vst.msk [vmem:[#allocation2] sm:$0xff] %vm325_vm2, %v1196_v18  ;;  %327 = vst.msk [vmem:[#allocation2 + $0x8] sm:$0xff] %vm325_vm2, %v1196_v18 }
  0x19   : > { %s1300_s7 = scalar_lea.vmem %s1458_s1, %s918_s30  ;;  %s296_s11 = scalar_lea.vmem %s1457_s0, %s917_s8  ;;  %328 = vst.msk [vmem:[#allocation3] sm:$0xff] %vm325_vm2, %v1194_v0  ;;  %329 = vst.msk [vmem:[#allocation3 + $0x8] sm:$0xff] %vm325_vm2, %v1194_v0  ;;  %v482_v20 = vand.u32 127, %v481_v19  ;;  %1055 = vset.pattern.permute.xlu1 %v1197_v27  ;;  %1056 = vset.pattern.permute.xlu0 %v1197_v27 }
  0x1a   : > { %v1057_v1 = vld [vmem:[%s1300_s7 + $0x38] sm:$0xff]   ;;  %v1058_v3 = vld [vmem:[%s1300_s7 + $0x30] sm:$0xff]   ;;  %v1059_v5 = vld [vmem:[%s1300_s7 + $0x28] sm:$0xff]   ;;  %s1341_s14 = scalar_lea.vmem %s1459_s2, %s918_s30  ;;  %s287_s29 = scalar_lea.vmem [#allocation8], %s879_s22 }
  0x1b   : > { %v438_v2 = vsel %vm330_vm0, %v1057_v1, 0  ;;  %v435_v4 = vsel %vm330_vm0, %v1058_v3, 0  ;;  %v432_v6 = vsel %vm330_vm0, %v1059_v5, 0  ;;  %v1060_v7 = vld [vmem:[%s1300_s7 + $0x20] sm:$0xff]   ;;  %v1061_v9 = vld [vmem:[%s1300_s7 + $0x18] sm:$0xff]   ;;  %v1062_v11 = vld [vmem:[%s1300_s7 + $0x10] sm:$0xff]   ;;  %s1377_s8 = scalar_lea.hbm %s1460_s3, %s924_s5  ;;  %p1089_p0 = pneg %p1088_p13 }
  0x1c   : > { %950 = vmatpush3.bf16.xpose.msra.mxu0 %v438_v2  ;;  %v429_v8 = vsel %vm330_vm0, %v1060_v7, 0  ;;  %v426_v10 = vsel %vm330_vm0, %v1061_v9, 0  ;;  %v423_v12 = vsel %vm330_vm0, %v1062_v11, 0  ;;  %v1063_v13 = vld [vmem:[%s1300_s7 + $0x8] sm:$0xff]   ;;  %v1064_v15 = vld [vmem:[%s1300_s7] sm:$0xff]   ;;  %vm486_vm3 = vcmp.lt.s32.totalorder %v482_v20, 16 }
  0x1d   : > { %951 = vmatprep.subr.bf16.mxu0 %v1194_v0  ;;  %v420_v14 = vsel %vm330_vm0, %v1063_v13, 0  ;;  %v417_v16 = vsel %vm330_vm0, %v1064_v15, 0  ;;  %v1065_v17 = vld [vmem:[%s296_s11] sm:$0xff]   ;;  %v1066_v28 = vld [vmem:[%s1341_s14 + $0x38] sm:$0xff]   ;;  %v1067_v29 = vld [vmem:[%s1341_s14 + $0x30] sm:$0xff]   ;;  %s721_s30 = sshll.u32 %s287_s29, 4  ;;  %s1372_s30 = int_to_ptr.vmem [resolvable:$true] %s721_s30 }
  0x1e   : > { %970 = vmatpush3.bf16.msra.mxu1 %v1066_v28  ;;  %v1068_v31 = vld [vmem:[%s1341_s14 + $0x28] sm:$0xff]   ;;  %v1069_v35 = vld [vmem:[%s1341_s14 + $0x20] sm:$0xff]   ;;  %v1070_v39 = vld [vmem:[%s1341_s14 + $0x18] sm:$0xff]   ;;  %s683_s11 = scalar_lea.sflag [#allocation7], %s1365_s21 }
  0x1f   : > { %971 = vmatprep.subr.bf16.mxu1 %v1194_v0  ;;  %v489_v30 = vld [vmem:[#allocation2] sm:$0xff]  ;;  %v490_v34 = vld [vmem:[#allocation2 + $0x8] sm:$0xff]  ;;  %v1071_v41 = vld [vmem:[%s1341_s14 + $0x10] sm:$0xff]  }
  0x20   : > { %v1072_v42 = vld [vmem:[%s1341_s14 + $0x8] sm:$0xff]   ;;  %v1073_v43 = vld [vmem:[%s1341_s14] sm:$0xff]   ;;  %v519_v57 = vld [vmem:[#allocation3] sm:$0xff]  ;;  %s1090_s14 = sshll.u32 %s1198_s13, 4  ;;  %s1091_s14 = int_to_ptr.vmem [resolvable:$false] %s1090_s14 }
  0x21   : > { %v520_v60 = vld [vmem:[#allocation3 + $0x8] sm:$0xff]  ;;  %v529_v3 = vld [vmem:[#allocation4] sm:$0xff]  ;;  %s1092_s22 = scalar_lea.vmem %s1091_s14, 256  ;;  %p1093_p1 = scmp.lt.s32.totalorder %s1370_s26, %s1091_s14 }
  0x22   : > { %972 = vmatpush3.bf16.msra.mxu1 %v1067_v29  ;;  %p1094_p2 = scmp.lt.s32.totalorder %s1092_s22, %s1086_s12 }
  0x23   : > { %973 = vmatprep.subr.bf16.mxu1 %v1194_v0 }
  0x24   : > { %952 = vmatpush3.bf16.xpose.msra.mxu0 %v435_v4  ;;  %p1095_p3 = por %p1094_p2, %p1093_p1 }
  0x25   : > { %953 = vmatprep.subr.bf16.mxu0 %v1194_v0 }
  0x26   : > { %974 = vmatpush3.bf16.msra.mxu1 %v1068_v31  ;;  %p1096_p5 = pnand %p1095_p3, %p1089_p0 }
  0x27   : > { %975 = vmatprep.subr.bf16.mxu1 %v1194_v0 }
  0x2a   : > { %976 = vmatpush3.bf16.msra.mxu1 %v1069_v35 }
  0x2b   : > { %977 = vmatprep.subr.bf16.mxu1 %v1194_v0 }
  0x2c   : > { %954 = vmatpush3.bf16.xpose.msra.mxu0 %v432_v6  ;;  %v530_v6 = vld [vmem:[#allocation4 + $0x8] sm:$0xff] }
  0x2d   : > { %955 = vmatprep.subr.bf16.mxu0 %v1194_v0 }
  0x2e   : > { %978 = vmatpush3.bf16.msra.mxu1 %v1070_v39 }
  0x2f   : > { %979 = vmatprep.subr.bf16.mxu1 %v1194_v0 }
  0x32   : > { %980 = vmatpush3.bf16.msra.mxu1 %v1071_v41 }
  0x33   : > { %981 = vmatprep.subr.bf16.mxu1 %v1194_v0 }
  0x34   : > { %956 = vmatpush3.bf16.xpose.msra.mxu0 %v429_v8 }
  0x35   : > { %957 = vmatprep.subr.bf16.mxu0 %v1194_v0 }
  0x36   : > { %982 = vmatpush3.bf16.msra.mxu1 %v1072_v42 }
  0x37   : > { %983 = vmatprep.subr.bf16.mxu1 %v1194_v0 }
  0x3a   : > { %984 = vmatpush3.bf16.msra.mxu1 %v1073_v43 }
  0x3c   : > { %958 = vmatpush3.bf16.xpose.msra.mxu0 %v426_v10 }
  0x3d   : > { %959 = vmatprep.subr.bf16.mxu0 %v1194_v0 }
  0x44   : > { %960 = vmatpush3.bf16.xpose.msra.mxu0 %v423_v12 }
  0x45   : > { %961 = vmatprep.subr.bf16.mxu0 %v1194_v0 }
  0x4c   : > { %962 = vmatpush3.bf16.xpose.msra.mxu0 %v420_v14 }
  0x4d   : > { %963 = vmatprep.subr.bf16.mxu0 %v1194_v0 }
  0x54   : > { %964 = vmatpush3.bf16.xpose.msra.mxu0 %v417_v16 }
  0x5b   : > { %966 = vmatmul.mubr.msk.bf16.vlgmr.msra.gmra.mxu0 %vm330_vm0, %v1065_v17 }
 0x11b   : > { %v474_v21 = vpop.f32.mrf.mxu0 }
 0x11c   : > { %v487_v22 = vsel %vm486_vm3, %v474_v21, -inf }
 0x11d   : > { %491 = vmax.xlane.f32.xlu0 %v487_v22  ;;  %v967_v23 = vpop.f32.mrf.mxu0 }
 0x11f   : > { %v477_v24 = vpop.f32.mrf.mxu0 }
 0x120   : > { %v488_v25 = vsel %vm486_vm3, %v477_v24, -inf }
 0x121   : > { %493 = vmax.xlane.f32.xlu0 %v488_v25  ;;  %v968_v26 = vpop.f32.mrf.mxu0 }
 0x1a6   : > { %v492_v32 = vpop.xlane.xlu0 %491 }
 0x1a7   : > { %v495_v33 = vmax.f32 %v489_v30, %v492_v32 }
 0x1a9   : > { %v497_v36 = vsub.f32 %v489_v30, %v495_v33  ;;  %636 = vst.msk [vmem:[#allocation2] sm:$0xff] %vm325_vm2, %v495_v33  ;;  %505 = vperm.xlu1 %1055, %v495_v33  }
 0x1aa   : > { %v494_v37 = vpop.xlane.xlu0 %493 }
 0x1ab   : > { %v496_v38 = vmax.f32 %v490_v34, %v494_v37  ;;  %v499_v53 = vmul.f32 1.442695, %v497_v36 }
 0x1ad   : > { %v498_v40 = vsub.f32 %v490_v34, %v496_v38  ;;  %637 = vst.msk [vmem:[#allocation2 + $0x8] sm:$0xff] %vm325_vm2, %v496_v38  ;;  %510 = vperm.xlu1 %1055, %v496_v38  }
 0x1af   : > { %v501_v52 = vmul.f32 1.442695, %v498_v40 }
 0x224   : > { %v506_v44 = vpop.permute.xlu1 %505 }
 0x225   : > { %v513_v45 = vsub.f32 %v487_v22, %v506_v44 }
 0x227   : > { %v515_v46 = vmul.f32 1.442695, %v513_v45 }
 0x228   : > { %v511_v47 = vpop.permute.xlu1 %510 }
 0x229   : > { %1074 = vpow2.f32 %v515_v46  ;;  %v514_v48 = vsub.f32 %v488_v25, %v511_v47 }
 0x22b   : > { %v517_v49 = vmul.f32 1.442695, %v514_v48 }
 0x22d   : > { %1076 = vpow2.f32 %v517_v49 }
 0x22e   : > { %1078 = vpow2.f32 %v501_v52 }
 0x22f   : > { %1080 = vpow2.f32 %v499_v53 }
 0x236   : > { %v1075_v50 = vpop.eup %1074 }
 0x237   : > { %523 = vadd.xlane.f32.xlu0 %v1075_v50 }
 0x23a   : > { %v1077_v51 = vpop.eup %1076 }
 0x23b   : > { %525 = vadd.xlane.f32.xlu1 %v1077_v51  ;;  %v543_v54 = vpack.c.bf16 %v1077_v51, %v1075_v50  ;;  %v1079_v55 = vpop.eup %1078 }
 0x23c   : > { %v1081_v56 = vpop.eup %1080  ;;  %v522_v62 = vmul.f32 %v1079_v55, %v520_v60 }
 0x23d   : > { %986 = vmatmul.mubr.bf16.vlgmr.msra.gmra.mxu1 %v543_v54  ;;  %v521_v58 = vmul.f32 %v1081_v56, %v519_v57 }
 0x24c   : > { %538 = vperm.xlu1 %1055, %v1079_v55  }
 0x24d   : > { %533 = vperm.xlu0 %1056, %v1081_v56  }
 0x2c0   : > { %v524_v59 = vpop.xlane.xlu0 %523 }
 0x2c1   : > { %v527_v61 = vadd.f32 %v524_v59, %v521_v58 }
 0x2c3   : > { %638 = vst.msk [vmem:[#allocation3] sm:$0xff] %vm325_vm2, %v527_v61  ;;  %1082 = vrcp.f32 %v527_v61 }
 0x2c4   : > { %v526_v63 = vpop.xlane.xlu1 %525 }
 0x2c5   : > { %v528_v0 = vadd.f32 %v526_v63, %v522_v62 }
 0x2c7   : > { %639 = vst.msk [vmem:[#allocation3 + $0x8] sm:$0xff] %vm325_vm2, %v528_v0  ;;  %1084 = vrcp.f32 %v528_v0 }
 0x2c8   : > { %v534_v4 = vpop.permute.xlu0 %533  ;;  %v539_v7 = vpop.permute.xlu1 %538 }
 0x2c9   : > { %v541_v5 = vmul.f32 %v534_v4, %v529_v3  ;;  %v542_v11 = vmul.f32 %v539_v7, %v530_v6 }
 0x2d0   : > { %v1083_v1 = vpop.eup %1082 }
 0x2d1   : > { %649 = vperm.xlu0 %1056, %v1083_v1  }
 0x2d4   : > { %v1085_v2 = vpop.eup %1084 }
 0x2d5   : > { %654 = vperm.xlu0 %1056, %v1085_v2  }
 0x2fd   : > { %v626_v8 = vpop.f32.mrf.mxu1 }
 0x2fe   : > { %v633_v9 = vadd.f32 %v626_v8, %v541_v5 }
 0x2ff   : > { %v987_v10 = vpop.f32.mrf.mxu1 }
 0x300   : > { %640 = vst.msk [vmem:[#allocation4] sm:$0xff] %vm330_vm0, %v633_v9 }
 0x301   : > { %v629_v12 = vpop.f32.mrf.mxu1 }
 0x302   : > { %v634_v13 = vadd.f32 %v629_v12, %v542_v11 }
 0x303   : > { %v988_v14 = vpop.f32.mrf.mxu1 }
 0x304   : > { %641 = vst.msk [vmem:[#allocation4 + $0x8] sm:$0xff] %vm330_vm0, %v634_v13 }
 0x34c   : > { %v650_v15 = vpop.permute.xlu0 %649 }
 0x34d   : > { %v657_v16 = vmul.f32 %v650_v15, %v633_v9  ;;  %v670_v19 = vmul.f32 %v1075_v50, %v650_v15 }
 0x34f   : > { %v920_v17 = vpack.c.bf16 %v657_v16, %v657_v16 }
 0x350   : > { %v655_v18 = vpop.permute.xlu0 %654 }
 0x351   : > { %v658_v20 = vmul.f32 %v655_v18, %v634_v13  ;;  %668 = vst.msk [vmem:[%s280_s24] sm:$0xf] %vm667_vm4, %v920_v17  ;;  %v671_v21 = vmul.f32 %v1077_v51, %v655_v18 }
 0x353   : > { %v921_v22 = vpack.c.bf16 %v658_v20, %v658_v20  ;;  %v929_v23 = vpack.c.bf16 %v671_v21, %v670_v19 }
 0x355   : > { %669 = vst.msk [vmem:[%s280_s24 + $0x4] sm:$0xf] %vm667_vm4, %v921_v22  ;;  %930 = vst [vmem:[%s287_s29] sm:$0xff] %v929_v23  }
 0x356   : > { %1099 = shalt.err (!%p1096_p5)
}
 0x357   : > { %s1100_s24 = scalar_lea.hbm %s1377_s8, 128  ;;  %s1104_s6 = scalar_lea.hbm %s1460_s3, 256 }
 0x358   : > { %p1101_p6 = scmp.ne.s32.totalorder %s1377_s8, %s1100_s24  ;;  %p1105_p10 = scmp.lt.s32.totalorder %s1377_s8, %s1460_s3 }
 0x359   : > { %p1106_p11 = scmp.lt.s32.totalorder %s1104_s6, %s1100_s24 }
 0x35a   : > { %p1102_p7 = pnand %p1101_p6, %p1267_p4 }
 0x35b   : > { %p1107_p12 = por %p1106_p11, %p1105_p10 }
 0x35c   : > { %p1103_p9 = pneg %p1102_p7 }
 0x35e   : > { %p1108_p13 = pnand %p1107_p12, %p1103_p9 }
 0x360   : > { %1111 = shalt.err (!%p1108_p13)
}
 0x361   : > { %s1199_s9 = smov 64   ;;  %s1200_s12 = smov 4  }
 0x362   : > { %989 = dma.vmem_to_hbm [thread:$0]  (%p1267_p4), %s1370_s26, 128, %s1377_s8, %s683_s11, %s1199_s9, %s1199_s9, %s1200_s12  }
 0x363   : > { %s688_s13 = scalar_lea.sflag [#allocation9], %s1365_s21  ;;  %s1112_s14 = scalar_lea.vmem %s1372_s30, 128 }
 0x364   : > { %p1113_p0 = scmp.ne.s32.totalorder %s1372_s30, %s1112_s14  ;;  %s1201_s22 = smov [#allocation8]  }
 0x365   : > { %s1116_s24 = sshll.u32 %s1201_s22, 4  ;;  %s1117_s24 = int_to_ptr.vmem [resolvable:$false] %s1116_s24 }
 0x366   : > { %p1114_p1 = pnand %p1113_p0, %p1267_p4  ;;  %s1118_s29 = scalar_lea.vmem %s1117_s24, 256 }
 0x367   : > { %p1119_p3 = scmp.lt.s32.totalorder %s1372_s30, %s1117_s24  ;;  %p1120_p5 = scmp.lt.s32.totalorder %s1118_s29, %s1112_s14 }
 0x368   : > { %p1115_p2 = pneg %p1114_p1 }
 0x369   : > { %p1121_p6 = por %p1120_p5, %p1119_p3 }
 0x36b   : > { %p1122_p7 = pnand %p1121_p6, %p1115_p2 }
 0x36d   : > { %1125 = shalt.err (!%p1122_p7)
}
 0x36e   : > { %s1126_s26 = scalar_lea.hbm %s1382_s10, 128  ;;  %s1130_s11 = scalar_lea.hbm %s1461_s4, 256 }
 0x36f   : > { %p1127_p9 = scmp.ne.s32.totalorder %s1382_s10, %s1126_s26  ;;  %p1131_p12 = scmp.lt.s32.totalorder %s1382_s10, %s1461_s4 }
 0x370   : > { %p1132_p13 = scmp.lt.s32.totalorder %s1130_s11, %s1126_s26 }
 0x371   : > { %p1128_p10 = pnand %p1127_p9, %p1267_p4 }
 0x372   : > { %p1133_p0 = por %p1132_p13, %p1131_p12 }
 0x373   : > { %p1129_p11 = pneg %p1128_p10 }
 0x375   : > { %p1134_p1 = pnand %p1133_p0, %p1129_p11 }
 0x377   : > { %1137 = shalt.err (!%p1134_p1)
}
 0x378   : > { %990 = dma.vmem_to_hbm [thread:$0]  (%p1267_p4), %s1372_s30, 128, %s1382_s10, %s688_s13, %s1199_s9, %s1199_s9, %s1200_s12  }
 0x379 PF: > { %p1000_p2 = scmp.ge.s32.totalorder %s1192_s20, 2  ;;  %s736_s7 = sand.u32 1, %s1172_s15  }
 0x37a   : > { %s737_s18 = scalar_lea.sflag [#allocation7], %s736_s7 }
 0x37b   : > { %p994_p3 = pnand %p1000_p2, %p1274_p8 }
 0x37d   : > { %p995_p5 = pneg %p994_p3 }
 0x37f   : > { %1163 = dma.done.wait (%p995_p5), %s737_s18, 128  }
 0x380   : > { %1165 = vsyncadd (%p995_p5), %s737_s18, 4294967168  ;;  %s746_s14 = scalar_lea.sflag [#allocation9], %s736_s7 }
 0x381   : > { %1167 = dma.done.wait (%p995_p5), %s746_s14, 128  }
 0x382   : > { %1169 = vsyncadd (%p995_p5), %s746_s14, 4294967168  ;;  %s21_s20 = sadd.s32 1, %s1192_s20   ;;  %s1464_s15 = smov %s1176_s16 }
 0x383   : > { %p18_p6 = scmp.ge.s32.totalorder %s21_s20, 4   ;;  %s1465_s16 = smov %s1180_s17 }
 0x384   : > { %s1466_s17 = smov %s1280_s28  ;;  %s1467_s18 = smov %s1188_s19 }
 0x385   : > { %s1468_s19 = smov %s1470_s23  ;;  %20 = sbr.rel (!%p18_p6) target bundleno = 6 (0x6), region = 98 }
 0x38a   :  { %751 = vsyncpa [#allocation7], 1 }
 0x38b   :  { %753 = vsyncpa [#allocation7 + $0x1], 1 }
 0x38c   :  { %754 = vsyncpa [#allocation9], 1 }
 0x38d   :  { %756 = vsyncpa [#allocation9 + $0x1], 1 }

</bundles_post_ra>
